<compile_context>
chip_gen: v6e
topology: v6e:2x2x1
jax: 0.10.0
libtpu: 0.0.40
codegen_flags: <defaults>
</compile_context>

<pallas_src>
import functools

import numpy as np

import jax
import jax.numpy as jnp
from jax import lax
from jax.experimental import pallas as pl
from jax.experimental.pallas import tpu as pltpu

STATE_SIZE = 16
LATENT_SIZE = 32
SIMNORM_DIM = 8            # TD-MPC2 default simnorm group size
LN_EPS = 1e-5              # PyTorch nn.LayerNorm default eps
MAX_BATCH_TILE = 4096      # lane-axis batch tile (multiple of 128)

_GROUPS = np.arange(LATENT_SIZE) // SIMNORM_DIM
_GMAT = (_GROUPS[:, None] == _GROUPS[None, :]).astype(np.float32)   # (32, 32) block-diag


def _encoder_kernel(x_ref, w1_ref, w2_ref, vec_ref, gmat_ref, o_ref):
    """Feature-major compute: features on sublanes, the batch tile on the 128-lane axis."""
    x = x_ref[...]                 # (TB, STATE_SIZE) batch-major, straight from HBM
    vecs = vec_ref[...]            # (LATENT_SIZE, 6): [b1c, g1, be1, b2c, g2, be2]
    b1c, g1, be1 = vecs[:, 0:1], vecs[:, 1:2], vecs[:, 2:3]
    b2c, g2, be2 = vecs[:, 3:4], vecs[:, 4:5], vecs[:, 5:6]

    # ---- layer 1: Linear -> LayerNorm -> Mish --------------------------------------
    # W1c/b1c are column-centered in the wrapper, so  h - mean(h) == W1c @ x^T + b1c
    # exactly and the cross-sublane mean reduction disappears.  x^T never materializes:
    # the MXU contracts x's minor dim directly (A @ B^T form).
    hc = lax.dot_general(w1_ref[...], x, (((1,), (1,)), ((), ())),
                         preferred_element_type=jnp.float32) + b1c            # (32, TB)
    var = jnp.mean(hc * hc, axis=0, keepdims=True)
    hn = hc * lax.rsqrt(var + LN_EPS) * g1 + be1

    # Mish(x) = x * tanh(softplus(x)) = x * (u^2 - 1) / (u^2 + 1),  u = 1 + e^x.
    # Clamp: for x >= 20, Mish(x) == x to f32 precision.  One Newton step refines the
    # approximate EUP reciprocal (2 cheap VPU ops).
    u = 1.0 + jnp.exp(jnp.minimum(hn, 20.0))
    u2 = u * u
    d1 = u2 + 1.0
    r1 = pl.reciprocal(d1, approx=True)
    r1 = r1 * (2.0 - d1 * r1)
    a1 = hn * (u2 - 1.0) * r1

    # ---- layer 2: Linear -> LayerNorm -> SimNorm -----------------------------------
    h2c = lax.dot_general(w2_ref[...], a1, (((1,), (0,)), ((), ())),
                          preferred_element_type=jnp.float32) + b2c           # (32, TB)
    var2 = jnp.mean(h2c * h2c, axis=0, keepdims=True)
    z = h2c * lax.rsqrt(var2 + LN_EPS) * g2 + be2

    # SimNorm: softmax within each contiguous group of SIMNORM_DIM features (axis 0).
    # The per-column max is a constant shift inside every group -> groupwise softmax
    # unchanged, exp stays stable.  Group sums via ONE matmul with the block-diagonal
    # G; Newton-refined reciprocal so group sums are ~1 to ~1e-6.
    m = jnp.max(z, axis=0, keepdims=True)
    e = jnp.exp(z - m)
    denom = jnp.dot(gmat_ref[...], e, preferred_element_type=jnp.float32)
    rd = pl.reciprocal(denom, approx=True)
    rd = rd * (2.0 - denom * rd)
    y = e * rd                                                                # (32, TB)

    # Store batch-major so the wrapper needs no HBM transpose.  (v5e note: this is a
    # 32/128-lane masked-store path; if a bundle dump shows the single vst slot
    # saturating there, flip the out block back to feature-major on v5e only.)
    o_ref[...] = y.T.astype(o_ref.dtype)


def _round_up(x, m):
    return (x + m - 1) // m * m


def _on_multi_core_chip() -> bool:
    """True on chips with >1 TensorCore per chip (v7x): split the grid across cores."""
    try:
        kind = jax.devices()[0].device_kind.lower()
    except Exception:
        return False
    return ("v7" in kind) or ("7x" in kind)


@functools.partial(jax.jit, static_argnames=("out_dtype",))
def encoder_net_forward(state, params, out_dtype=jnp.float32):
    """state: (B, STATE_SIZE) -> (B, LATENT_SIZE)."""
    B = state.shape[0]
    x = state.astype(jnp.float32)

    two_cores = _on_multi_core_chip()
    b128 = _round_up(max(B, 1), 128)
    if two_cores and b128 >= 256:
        # Guarantee >= 2 grid steps so both v7x TensorCores get work.
        tb = min(MAX_BATCH_TILE, _round_up(b128 // 2, 128))
    else:
        tb = min(MAX_BATCH_TILE, b128)
    b_pad = _round_up(b128, tb)
    grid = (b_pad // tb,)

    # Single fused pad of the batch axis only (no transposes; a no-op when B is already
    # tile-aligned).  Zero rows flow through LN/Mish/SimNorm to finite values and are
    # sliced away below.
    if b_pad != B:
        x = jnp.pad(x, ((0, b_pad - B), (0, 0)))

    # Fold the LayerNorm mean-subtraction into the weights (mathematically exact):
    #   h - mean_feat(h) == (W - colmean(W)) @ x + (b - mean(b))
    w1 = params["w1"].astype(jnp.float32)
    w2 = params["w2"].astype(jnp.float32)
    w1c = w1 - jnp.mean(w1, axis=0, keepdims=True)
    w2c = w2 - jnp.mean(w2, axis=0, keepdims=True)
    b1c = params["b1"].astype(jnp.float32) - jnp.mean(params["b1"])
    b2c = params["b2"].astype(jnp.float32) - jnp.mean(params["b2"])
    vecs = jnp.stack(
        [b1c, params["ln1_g"], params["ln1_b"],
         b2c, params["ln2_g"], params["ln2_b"]], axis=1).astype(jnp.float32)   # (32, 6)
    gmat = jnp.asarray(_GMAT)

    data_map = lambda i: (i, 0)      # tiles walk the batch axis
    const_map = lambda i: (0, 0)     # weights stay resident across grid steps

    out = pl.pallas_call(
        _encoder_kernel,
        out_shape=jax.ShapeDtypeStruct((b_pad, LATENT_SIZE), out_dtype),
        grid=grid,
        in_specs=[
            pl.BlockSpec((tb, STATE_SIZE), data_map),                 # x (batch-major)
            pl.BlockSpec((LATENT_SIZE, STATE_SIZE), const_map),       # W1c
            pl.BlockSpec((LATENT_SIZE, LATENT_SIZE), const_map),      # W2c
            pl.BlockSpec((LATENT_SIZE, 6), const_map),                # packed bias/LN vecs
            pl.BlockSpec((LATENT_SIZE, LATENT_SIZE), const_map),      # G (SimNorm groups)
        ],
        out_specs=pl.BlockSpec((tb, LATENT_SIZE), data_map),
        compiler_params=pltpu.CompilerParams(
            dimension_semantics=((pltpu.CORE_PARALLEL,) if two_cores
                                 else ("parallel",))),
    )(x, w1c, w2c, vecs, gmat)

    return out if b_pad == B else out[:B]


def init_params(key):
    """Deterministic synthetic params; shapes/layout match the PyTorch module
    (weights in native nn.Linear (out, in) layout, 1-D biases/LN params)."""
    k1, k2, k3, k4 = jax.random.split(key, 4)
    lim1 = 1.0 / jnp.sqrt(float(STATE_SIZE))
    lim2 = 1.0 / jnp.sqrt(float(LATENT_SIZE))
    return {
        "w1": jax.random.uniform(k1, (LATENT_SIZE, STATE_SIZE), jnp.float32, -lim1, lim1),
        "b1": jax.random.uniform(k2, (LATENT_SIZE,), jnp.float32, -lim1, lim1),
        "ln1_g": jnp.ones((LATENT_SIZE,), jnp.float32),
        "ln1_b": jnp.zeros((LATENT_SIZE,), jnp.float32),
        "w2": jax.random.uniform(k3, (LATENT_SIZE, LATENT_SIZE), jnp.float32, -lim2, lim2),
        "b2": jax.random.uniform(k4, (LATENT_SIZE,), jnp.float32, -lim2, lim2),
        "ln2_g": jnp.ones((LATENT_SIZE,), jnp.float32),
        "ln2_b": jnp.zeros((LATENT_SIZE,), jnp.float32),
    }


def _reference(state, p):
    """Pure-JAX reference of the PyTorch forward, for checking."""
    h = state @ p["w1"].T + p["b1"]
    mu = h.mean(-1, keepdims=True)
    var = ((h - mu) ** 2).mean(-1, keepdims=True)
    hn = (h - mu) / jnp.sqrt(var + LN_EPS) * p["ln1_g"] + p["ln1_b"]
    a1 = hn * jnp.tanh(jax.nn.softplus(hn))                          # Mish

    h2 = a1 @ p["w2"].T + p["b2"]
    mu2 = h2.mean(-1, keepdims=True)
    var2 = ((h2 - mu2) ** 2).mean(-1, keepdims=True)
    z = (h2 - mu2) / jnp.sqrt(var2 + LN_EPS) * p["ln2_g"] + p["ln2_b"]
    zg = z.reshape(z.shape[0], -1, SIMNORM_DIM)
    return jax.nn.softmax(zg, axis=-1).reshape(z.shape)              # SimNorm


if __name__ == "__main__":
    key = jax.random.PRNGKey(0)
    pkey, xkey = jax.random.split(key)
    params = init_params(pkey)
    B = 2
    state = jax.random.normal(xkey, (B, STATE_SIZE), jnp.float32)

    out = jax.block_until_ready(encoder_net_forward(state, params))
    ref = _reference(state, params)

    assert out.shape == (B, LATENT_SIZE)
    assert out.dtype == jnp.float32
    # MXU matmuls + Newton-refined EUP reciprocals: comfortably inside 5e-3 of the
    # exact PyTorch-equivalent reference.
    assert jnp.allclose(out, ref, atol=5e-3, rtol=5e-3), float(jnp.max(jnp.abs(out - ref)))
    # SimNorm output: each group of SIMNORM_DIM sums to ~1.
    assert jnp.allclose(out.reshape(B, -1, SIMNORM_DIM).sum(-1), 1.0, atol=5e-3)
    print("KERNEL_OK")
</pallas_src>

<mosaic_0001>
module attributes {stable_mosaic.version = 11 : i64} {
  func.func @_encoder_kernel(%arg0: i32, %arg1: memref<128x16xf32, #tpu.memory_space<vmem>>, %arg2: memref<32x16xf32, #tpu.memory_space<vmem>>, %arg3: memref<32x32xf32, #tpu.memory_space<vmem>>, %arg4: memref<32x6xf32, #tpu.memory_space<vmem>>, %arg5: memref<32x32xf32, #tpu.memory_space<vmem>>, %arg6: memref<128x32xf32, #tpu.memory_space<vmem>>) attributes {dimension_semantics = [#tpu.dimension_semantics<parallel>], iteration_bounds = array<i64: 1>, scalar_prefetch = 0 : i64, scratch_operands = 0 : i64, tpu.core_type = #tpu.core_type<tc>, window_params = [{transform_indices = @transform_0, window_bounds = array<i64: 128, 16>}, {pipeline_mode = #tpu.pipeline_mode<synchronous>, transform_indices = @transform_1, window_bounds = array<i64: 32, 16>}, {pipeline_mode = #tpu.pipeline_mode<synchronous>, transform_indices = @transform_2, window_bounds = array<i64: 32, 32>}, {pipeline_mode = #tpu.pipeline_mode<synchronous>, transform_indices = @transform_3, window_bounds = array<i64: 32, 6>}, {pipeline_mode = #tpu.pipeline_mode<synchronous>, transform_indices = @transform_4, window_bounds = array<i64: 32, 32>}, {transform_indices = @transform_5, window_bounds = array<i64: 128, 32>}]} {
    %c0 = arith.constant 0 : index
    %c0_0 = arith.constant 0 : index
    %0 = vector.load %arg1[%c0, %c0_0] : memref<128x16xf32, #tpu.memory_space<vmem>>, vector<128x16xf32>
    %c0_1 = arith.constant 0 : index
    %c0_2 = arith.constant 0 : index
    %1 = vector.load %arg4[%c0_1, %c0_2] : memref<32x6xf32, #tpu.memory_space<vmem>>, vector<32x6xf32>
    %2 = vector.extract_strided_slice %1 {offsets = [0, 0], sizes = [32, 1], strides = [1, 1]} : vector<32x6xf32> to vector<32x1xf32>
    %3 = vector.extract_strided_slice %1 {offsets = [0, 1], sizes = [32, 1], strides = [1, 1]} : vector<32x6xf32> to vector<32x1xf32>
    %4 = vector.extract_strided_slice %1 {offsets = [0, 2], sizes = [32, 1], strides = [1, 1]} : vector<32x6xf32> to vector<32x1xf32>
    %5 = vector.extract_strided_slice %1 {offsets = [0, 3], sizes = [32, 1], strides = [1, 1]} : vector<32x6xf32> to vector<32x1xf32>
    %6 = vector.extract_strided_slice %1 {offsets = [0, 4], sizes = [32, 1], strides = [1, 1]} : vector<32x6xf32> to vector<32x1xf32>
    %7 = vector.extract_strided_slice %1 {offsets = [0, 5], sizes = [32, 1], strides = [1, 1]} : vector<32x6xf32> to vector<32x1xf32>
    %c0_3 = arith.constant 0 : index
    %c0_4 = arith.constant 0 : index
    %8 = vector.load %arg2[%c0_3, %c0_4] : memref<32x16xf32, #tpu.memory_space<vmem>>, vector<32x16xf32>
    %cst = arith.constant dense<0.000000e+00> : vector<32x128xf32>
    %9 = tpu.matmul %8, %0, %cst {dimension_numbers = #tpu.dot_dimension_numbers<[1], [1], [0], [0], [0, 0, 1, 0], [], []>} : vector<32x16xf32>, vector<128x16xf32>, vector<32x128xf32> -> vector<32x128xf32>
    %10 = vector.broadcast %2 : vector<32x1xf32> to vector<32x128xf32>
    %11 = arith.addf %9, %10 : vector<32x128xf32>
    %12 = arith.mulf %11, %11 : vector<32x128xf32>
    %cst_5 = arith.constant dense<0.000000e+00> : vector<128xf32>
    %13 = vector.multi_reduction <add>, %12, %cst_5 [0] : vector<32x128xf32> to vector<128xf32>
    %14 = vector.shape_cast %13 : vector<128xf32> to vector<1x128xf32>
    %cst_6 = arith.constant 3.200000e+01 : f32
    %15 = vector.broadcast %cst_6 : f32 to vector<1x128xf32>
    %16 = arith.divf %14, %15 : vector<1x128xf32>
    %cst_7 = arith.constant 9.99999974E-6 : f32
    %17 = vector.broadcast %cst_7 : f32 to vector<1x128xf32>
    %18 = arith.addf %16, %17 : vector<1x128xf32>
    %19 = math.rsqrt %18 : vector<1x128xf32>
    %20 = vector.broadcast %19 : vector<1x128xf32> to vector<32x128xf32>
    %21 = arith.mulf %11, %20 : vector<32x128xf32>
    %22 = vector.broadcast %3 : vector<32x1xf32> to vector<32x128xf32>
    %23 = arith.mulf %21, %22 : vector<32x128xf32>
    %24 = vector.broadcast %4 : vector<32x1xf32> to vector<32x128xf32>
    %25 = arith.addf %23, %24 : vector<32x128xf32>
    %cst_8 = arith.constant 2.000000e+01 : f32
    %26 = vector.broadcast %cst_8 : f32 to vector<32x128xf32>
    %27 = arith.minimumf %25, %26 : vector<32x128xf32>
    %28 = math.exp %27 : vector<32x128xf32>
    %cst_9 = arith.constant 1.000000e+00 : f32
    %29 = vector.broadcast %cst_9 : f32 to vector<32x128xf32>
    %30 = arith.addf %29, %28 : vector<32x128xf32>
    %31 = arith.mulf %30, %30 : vector<32x128xf32>
    %cst_10 = arith.constant 1.000000e+00 : f32
    %32 = vector.broadcast %cst_10 : f32 to vector<32x128xf32>
    %33 = arith.addf %31, %32 : vector<32x128xf32>
    %34 = tpu.reciprocal %33 {approx = true} : vector<32x128xf32> -> vector<32x128xf32>
    %35 = arith.mulf %33, %34 : vector<32x128xf32>
    %cst_11 = arith.constant 2.000000e+00 : f32
    %36 = vector.broadcast %cst_11 : f32 to vector<32x128xf32>
    %37 = arith.subf %36, %35 : vector<32x128xf32>
    %38 = arith.mulf %34, %37 : vector<32x128xf32>
    %cst_12 = arith.constant 1.000000e+00 : f32
    %39 = vector.broadcast %cst_12 : f32 to vector<32x128xf32>
    %40 = arith.subf %31, %39 : vector<32x128xf32>
    %41 = arith.mulf %25, %40 : vector<32x128xf32>
    %42 = arith.mulf %41, %38 : vector<32x128xf32>
    %c0_13 = arith.constant 0 : index
    %c0_14 = arith.constant 0 : index
    %43 = vector.load %arg3[%c0_13, %c0_14] : memref<32x32xf32, #tpu.memory_space<vmem>>, vector<32x32xf32>
    %cst_15 = arith.constant dense<0.000000e+00> : vector<32x128xf32>
    %44 = tpu.matmul %43, %42, %cst_15 {dimension_numbers = #tpu.dot_dimension_numbers<[1], [0], [0], [1], [0, 0, 1, 1], [], []>} : vector<32x32xf32>, vector<32x128xf32>, vector<32x128xf32> -> vector<32x128xf32>
    %45 = vector.broadcast %5 : vector<32x1xf32> to vector<32x128xf32>
    %46 = arith.addf %44, %45 : vector<32x128xf32>
    %47 = arith.mulf %46, %46 : vector<32x128xf32>
    %cst_16 = arith.constant dense<0.000000e+00> : vector<128xf32>
    %48 = vector.multi_reduction <add>, %47, %cst_16 [0] : vector<32x128xf32> to vector<128xf32>
    %49 = vector.shape_cast %48 : vector<128xf32> to vector<1x128xf32>
    %cst_17 = arith.constant 3.200000e+01 : f32
    %50 = vector.broadcast %cst_17 : f32 to vector<1x128xf32>
    %51 = arith.divf %49, %50 : vector<1x128xf32>
    %cst_18 = arith.constant 9.99999974E-6 : f32
    %52 = vector.broadcast %cst_18 : f32 to vector<1x128xf32>
    %53 = arith.addf %51, %52 : vector<1x128xf32>
    %54 = math.rsqrt %53 : vector<1x128xf32>
    %55 = vector.broadcast %54 : vector<1x128xf32> to vector<32x128xf32>
    %56 = arith.mulf %46, %55 : vector<32x128xf32>
    %57 = vector.broadcast %6 : vector<32x1xf32> to vector<32x128xf32>
    %58 = arith.mulf %56, %57 : vector<32x128xf32>
    %59 = vector.broadcast %7 : vector<32x1xf32> to vector<32x128xf32>
    %60 = arith.addf %58, %59 : vector<32x128xf32>
    %cst_19 = arith.constant dense<0xFF800000> : vector<128xf32>
    %61 = vector.multi_reduction <maximumf>, %60, %cst_19 [0] : vector<32x128xf32> to vector<128xf32>
    %62 = vector.shape_cast %61 : vector<128xf32> to vector<1x128xf32>
    %63 = vector.broadcast %62 : vector<1x128xf32> to vector<32x128xf32>
    %64 = arith.subf %60, %63 : vector<32x128xf32>
    %65 = math.exp %64 : vector<32x128xf32>
    %c0_20 = arith.constant 0 : index
    %c0_21 = arith.constant 0 : index
    %66 = vector.load %arg5[%c0_20, %c0_21] : memref<32x32xf32, #tpu.memory_space<vmem>>, vector<32x32xf32>
    %cst_22 = arith.constant dense<0.000000e+00> : vector<32x128xf32>
    %67 = tpu.matmul %66, %65, %cst_22 {dimension_numbers = #tpu.dot_dimension_numbers<[1], [0], [0], [1], [0, 0, 1, 1], [], []>} : vector<32x32xf32>, vector<32x128xf32>, vector<32x128xf32> -> vector<32x128xf32>
    %68 = tpu.reciprocal %67 {approx = true} : vector<32x128xf32> -> vector<32x128xf32>
    %69 = arith.mulf %67, %68 : vector<32x128xf32>
    %cst_23 = arith.constant 2.000000e+00 : f32
    %70 = vector.broadcast %cst_23 : f32 to vector<32x128xf32>
    %71 = arith.subf %70, %69 : vector<32x128xf32>
    %72 = arith.mulf %68, %71 : vector<32x128xf32>
    %73 = arith.mulf %65, %72 : vector<32x128xf32>
    %74 = tpu.transpose %73, [1, 0] : vector<32x128xf32> -> vector<128x32xf32>
    %c0_24 = arith.constant 0 : index
    %c0_25 = arith.constant 0 : index
    %75 = vector.load %arg6[%c0_24, %c0_25] : memref<128x32xf32, #tpu.memory_space<vmem>>, vector<128x32xf32>
    tpu.vector_store %arg6[%c0_24, %c0_25], %74 {strides = array<i32>} : memref<128x32xf32, #tpu.memory_space<vmem>>, vector<128x32xf32>,
    return
  }
  func.func @transform_0(%arg0: i32) -> (i32, i32) {
    %c0_i32 = arith.constant 0 : i32
    %c0_i32_0 = arith.constant 0 : i32
    return %arg0, %c0_i32 : i32, i32
  }
  func.func @transform_1(%arg0: i32) -> (i32, i32) {
    %c0_i32 = arith.constant 0 : i32
    %c0_i32_0 = arith.constant 0 : i32
    %c0_i32_1 = arith.constant 0 : i32
    return %c0_i32, %c0_i32_0 : i32, i32
  }
  func.func @transform_2(%arg0: i32) -> (i32, i32) {
    %c0_i32 = arith.constant 0 : i32
    %c0_i32_0 = arith.constant 0 : i32
    %c0_i32_1 = arith.constant 0 : i32
    return %c0_i32, %c0_i32_0 : i32, i32
  }
  func.func @transform_3(%arg0: i32) -> (i32, i32) {
    %c0_i32 = arith.constant 0 : i32
    %c0_i32_0 = arith.constant 0 : i32
    %c0_i32_1 = arith.constant 0 : i32
    return %c0_i32, %c0_i32_0 : i32, i32
  }
  func.func @transform_4(%arg0: i32) -> (i32, i32) {
    %c0_i32 = arith.constant 0 : i32
    %c0_i32_0 = arith.constant 0 : i32
    %c0_i32_1 = arith.constant 0 : i32
    return %c0_i32, %c0_i32_0 : i32, i32
  }
  func.func @transform_5(%arg0: i32) -> (i32, i32) {
    %c0_i32 = arith.constant 0 : i32
    %c0_i32_0 = arith.constant 0 : i32
    return %arg0, %c0_i32 : i32, i32
  }
}

</mosaic_0001>

<bundles_post_ra>
// kernel: encoder_net_forward.1
= control target key start
LH: loop header
LB: loop body
LE: loop exit
PB: predicated region body
PF: predicated region fallthrough
CT: control target
= control target key end

     0   :  { %vm64_vm0 = vcmask 130048   ;;  %v884_v2 = vmov 0   ;;  %v885_v11 = vmov 1   ;;  %v886_v14 = vmov 2   ;;  %s1156_s0 = inlined_call_operand.vmem [shape: f32[128,16], index: 0, kind: input, shape index: {}]   ;;  %s1157_s1 = inlined_call_operand.vmem [shape: f32[32,16], index: 1, kind: input, shape index: {}]   ;;  %s1158_s3 = inlined_call_operand.vmem [shape: f32[32,6], index: 3, kind: input, shape index: {}]   ;;  %s1159_s2 = inlined_call_operand.vmem [shape: f32[32,32], index: 2, kind: input, shape index: {}]   ;;  %s1160_s4 = inlined_call_operand.vmem [shape: f32[32,32], index: 4, kind: input, shape index: {}]   ;;  %s1161_s5 = inlined_call_operand.vmem [shape: f32[128,32], index: 5, kind: output, shape index: {}]  }
   0x1   :  { %v35_v0 = vld [vmem:[%s1156_s0 + $0x78] sm:$0xff]  ;;  %v34_v1 = vld [vmem:[%s1156_s0 + $0x70] sm:$0xff]  ;;  %836 = vset.pattern.permute.xlu0 %v884_v2  ;;  %837 = vset.pattern.permute.xlu1 %v884_v2  ;;  %v33_v3 = vld [vmem:[%s1156_s0 + $0x68] sm:$0xff]  ;;  %vm343_vm1 = vcmask 261120   ;;  %v887_v28 = vmov 3   ;;  %v888_v29 = vmov 4  }
   0x2   :  { %763 = vmatprep.subr.msk.mxu0 %vm64_vm0, %v35_v0  ;;  %v40_v4 = vld [vmem:[%s1157_s1] sm:$0xff]  ;;  %v947_v6 = vld [vmem:[%s1158_s3 + $0x10] sm:$0xff]  ;;  %v956_v8 = vld [vmem:[%s1158_s3 + $0x8] sm:$0xff]  ;;  %v889_v30 = vmov 5  }
   0x3   :  { %764 = vmatpush3.xpose.msk.msra.mxu0 %vm64_vm0, %v35_v0  ;;  %795 = vmatprep.mubr.msk.f32.mxu0 %vm64_vm0, %v40_v4  ;;  %v940_v5 = vld [vmem:[%s1158_s3] sm:$0xff]  ;;  %v961_v9 = vld [vmem:[%s1158_s3 + $0x18] sm:$0xff]  ;;  %v30_v12 = vld [vmem:[%s1156_s0 + $0x50] sm:$0xff] }
   0x4   :  { %765 = vmatprep.subr.msk.mxu0 %vm64_vm0, %v34_v1  ;;  %46 = vperm.xlu0 %836, %v940_v5   ;;  %v32_v7 = vld [vmem:[%s1156_s0 + $0x60] sm:$0xff]  ;;  %v31_v10 = vld [vmem:[%s1156_s0 + $0x58] sm:$0xff]  ;;  %v29_v13 = vld [vmem:[%s1156_s0 + $0x48] sm:$0xff] }
   0x5   :  { %56 = vperm.xlu1 %837, %v947_v6   ;;  %v28_v15 = vld [vmem:[%s1156_s0 + $0x40] sm:$0xff]  ;;  %v27_v16 = vld [vmem:[%s1156_s0 + $0x38] sm:$0xff]  ;;  %v26_v17 = vld [vmem:[%s1156_s0 + $0x30] sm:$0xff] }
   0x6   :  { %v25_v18 = vld [vmem:[%s1156_s0 + $0x28] sm:$0xff]  ;;  %v24_v19 = vld [vmem:[%s1156_s0 + $0x20] sm:$0xff]  ;;  %v23_v20 = vld [vmem:[%s1156_s0 + $0x18] sm:$0xff] }
   0x7   :  { %766 = vmatpush3.xpose.msk.msra.mxu0 %vm64_vm0, %v34_v1  ;;  %v22_v21 = vld [vmem:[%s1156_s0 + $0x10] sm:$0xff]  ;;  %v21_v22 = vld [vmem:[%s1156_s0 + $0x8] sm:$0xff]  ;;  %v20_v23 = vld [vmem:[%s1156_s0] sm:$0xff] }
   0x8   :  { %767 = vmatprep.subr.msk.mxu0 %vm64_vm0, %v33_v3  ;;  %51 = vperm.xlu0 %836, %v956_v8   ;;  %v41_v24 = vld [vmem:[%s1157_s1 + $0x8] sm:$0xff]  ;;  %v42_v25 = vld [vmem:[%s1157_s1 + $0x10] sm:$0xff]  ;;  %v43_v26 = vld [vmem:[%s1157_s1 + $0x18] sm:$0xff] }
   0x9   :  { %61 = vperm.xlu1 %837, %v961_v9   ;;  %v323_v27 = vld [vmem:[%s1159_s2] sm:$0xff] }
   0xa   :  { %809 = vmatprep.mubr.msk.f32.mxu1 %vm343_vm1, %v323_v27 }
   0xb   :  { %768 = vmatpush3.xpose.msk.msra.mxu0 %vm64_vm0, %v33_v3 }
   0xc   :  { %769 = vmatprep.subr.msk.mxu0 %vm64_vm0, %v32_v7  ;;  %838 = vset.pattern.permute.xlu0 %v885_v11 }
   0xd   :  { %839 = vset.pattern.permute.xlu1 %v885_v11  ;;  %244 = vperm.xlu0 %838, %v961_v9  }
   0xe   :  { %240 = vperm.xlu1 %839, %v947_v6  }
   0xf   :  { %770 = vmatpush3.xpose.msk.msra.mxu0 %vm64_vm0, %v32_v7 }
  0x10   :  { %771 = vmatprep.subr.msk.mxu0 %vm64_vm0, %v31_v10 }
  0x11   :  { %236 = vperm.xlu0 %838, %v956_v8  }
  0x12   :  { %840 = vset.pattern.permute.xlu1 %v886_v14 }
  0x13   :  { %772 = vmatpush3.xpose.msk.msra.mxu0 %vm64_vm0, %v31_v10  ;;  %264 = vperm.xlu1 %840, %v961_v9  }
  0x14   :  { %773 = vmatprep.subr.msk.mxu0 %vm64_vm0, %v30_v12 }
  0x15   :  { %232 = vperm.xlu0 %838, %v940_v5  }
  0x17   :  { %774 = vmatpush3.xpose.msk.msra.mxu0 %vm64_vm0, %v30_v12  ;;  %260 = vperm.xlu1 %840, %v947_v6  }
  0x18   :  { %775 = vmatprep.subr.msk.mxu0 %vm64_vm0, %v29_v13 }
  0x19   :  { %841 = vset.pattern.permute.xlu0 %v886_v14 }
  0x1a   :  { %252 = vperm.xlu0 %841, %v940_v5  }
  0x1b   :  { %776 = vmatpush3.xpose.msk.msra.mxu0 %vm64_vm0, %v29_v13  ;;  %256 = vperm.xlu1 %840, %v956_v8  }
  0x1c   :  { %777 = vmatprep.subr.msk.mxu0 %vm64_vm0, %v28_v15 }
  0x1e   :  { %843 = vset.pattern.permute.xlu0 %v887_v28 }
  0x1f   :  { %778 = vmatpush3.xpose.msk.msra.mxu0 %vm64_vm0, %v28_v15  ;;  %842 = vset.pattern.permute.xlu1 %v887_v28 }
  0x20   :  { %779 = vmatprep.subr.msk.mxu0 %vm64_vm0, %v27_v16  ;;  %328 = vperm.xlu1 %842, %v940_v5  }
  0x21   :  { %336 = vperm.xlu0 %843, %v947_v6  }
  0x23   :  { %780 = vmatpush3.xpose.msk.msra.mxu0 %vm64_vm0, %v27_v16 }
  0x24   :  { %781 = vmatprep.subr.msk.mxu0 %vm64_vm0, %v26_v17  ;;  %332 = vperm.xlu1 %842, %v956_v8  }
  0x25   :  { %845 = vset.pattern.permute.xlu0 %v888_v29 }
  0x26   :  { %466 = vperm.xlu0 %845, %v956_v8  }
  0x27   :  { %782 = vmatpush3.xpose.msk.msra.mxu0 %vm64_vm0, %v26_v17 }
  0x28   :  { %783 = vmatprep.subr.msk.mxu0 %vm64_vm0, %v25_v18  ;;  %340 = vperm.xlu1 %842, %v961_v9  }
  0x2a   :  { %846 = vset.pattern.permute.xlu0 %v889_v30 }
  0x2b   :  { %784 = vmatpush3.xpose.msk.msra.mxu0 %vm64_vm0, %v25_v18  ;;  %482 = vperm.xlu0 %846, %v940_v5  }
  0x2c   :  { %785 = vmatprep.subr.msk.mxu0 %vm64_vm0, %v24_v19  ;;  %844 = vset.pattern.permute.xlu1 %v888_v29 }
  0x2d   :  { %462 = vperm.xlu1 %844, %v940_v5  }
  0x2f   :  { %786 = vmatpush3.xpose.msk.msra.mxu0 %vm64_vm0, %v24_v19  ;;  %494 = vperm.xlu0 %846, %v961_v9  }
  0x30   :  { %787 = vmatprep.subr.msk.mxu0 %vm64_vm0, %v23_v20 }
  0x31   :  { %470 = vperm.xlu1 %844, %v947_v6  }
  0x33   :  { %788 = vmatpush3.xpose.msk.msra.mxu0 %vm64_vm0, %v23_v20 }
  0x34   :  { %789 = vmatprep.subr.msk.mxu0 %vm64_vm0, %v22_v21 }
  0x35   :  { %474 = vperm.xlu1 %844, %v961_v9  }
  0x37   :  { %790 = vmatpush3.xpose.msk.msra.mxu0 %vm64_vm0, %v22_v21 }
  0x38   :  { %791 = vmatprep.subr.msk.mxu0 %vm64_vm0, %v21_v22 }
  0x39   :  { %847 = vset.pattern.permute.xlu1 %v889_v30 }
  0x3a   :  { %486 = vperm.xlu1 %847, %v956_v8  }
  0x3b   :  { %792 = vmatpush3.xpose.msk.msra.mxu0 %vm64_vm0, %v21_v22 }
  0x3c   :  { %793 = vmatprep.subr.msk.mxu0 %vm64_vm0, %v20_v23 }
  0x3e   :  { %490 = vperm.xlu1 %847, %v947_v6  }
  0x3f   :  { %794 = vmatpush3.xpose.msk.msra.mxu0 %vm64_vm0, %v20_v23 }
  0x42   :  { %796 = vmatmul.mubr.msk.f32.vlgmr.msra.gmra.mxu0 %vm64_vm0, %v41_v24 }
  0x43   :  { %798 = vmatprep.mubr.msk.f32.mxu0 %vm64_vm0, %v42_v25 }
  0x46   :  { %799 = vmatmul.mubr.msk.f32.gmra.mxu0 %vm64_vm0, %v43_v26 }
  0x7f   :  { %v47_v31 = vpop.permute.xlu0 %46 }
  0x80   :  { %v57_v32 = vpop.permute.xlu1 %56 }
  0x83   :  { %v52_v33 = vpop.permute.xlu0 %51 }
  0x84   :  { %v62_v38 = vpop.permute.xlu1 %61 }
  0x88   :  { %v245_v59 = vpop.permute.xlu0 %244 }
  0x89   :  { %v241_v58 = vpop.permute.xlu1 %240 }
  0x8c   :  { %v237_v61 = vpop.permute.xlu0 %236 }
  0x8e   :  { %v265_v60 = vpop.permute.xlu1 %264 }
  0x90   :  { %v233_v63 = vpop.permute.xlu0 %232 }
  0x92   :  { %v261_v62 = vpop.permute.xlu1 %260 }
  0x95   :  { %v253_v5 = vpop.permute.xlu0 %252 }
  0x96   :  { %v257_v10 = vpop.permute.xlu1 %256 }
 0x102   :  { %v797_v34 = vpop.f32.mrf.mxu0 }
 0x103   :  { %v197_v36 = vadd.f32 %v797_v34, %v52_v33 }
 0x104   :  { %v191_v35 = vpop.f32.mrf.mxu0 }
 0x105   :  { %v192_v37 = vadd.f32 %v191_v35, %v47_v31  ;;  %v211_v42 = vmul.f32 %v197_v36, %v197_v36 }
 0x106   :  { %v800_v39 = vpop.f32.mrf.mxu0 }
 0x107   :  { %v210_v40 = vmul.f32 %v192_v37, %v192_v37  ;;  %v207_v43 = vadd.f32 %v800_v39, %v62_v38 }
 0x108   :  { %v201_v41 = vpop.f32.mrf.mxu0 }
 0x109   :  { %v202_v44 = vadd.f32 %v201_v41, %v57_v32  ;;  %v214_v45 = vadd.f32 %v211_v42, %v210_v40  ;;  %v213_v47 = vmul.f32 %v207_v43, %v207_v43 }
 0x10b   :  { %v212_v46 = vmul.f32 %v202_v44, %v202_v44 }
 0x10d   :  { %v215_v48 = vadd.f32 %v214_v45, %v212_v46 }
 0x10f   :  { %v216_v49 = vadd.f32 %v215_v48, %v213_v47 }
 0x111   :  { %v217_v50 = vrot.slane %v216_v49, 4 }
 0x113   :  { %v218_v51 = vadd.f32 %v217_v50, %v216_v49 }
 0x115   :  { %v219_v52 = vrot.slane %v218_v51, 2 }
 0x117   :  { %v220_v53 = vadd.f32 %v219_v52, %v218_v51 }
 0x119   :  { %v221_v54 = vrot.slane %v220_v53, 1 }
 0x11b   :  { %v222_v55 = vadd.f32 %v221_v54, %v220_v53 }
 0x11d   :  { %v224_v56 = vmul.f32 0.03125, %v222_v55 }
 0x11f   :  { %v225_v57 = vadd.f32 1e-05, %v224_v56 }
 0x121   :  { %848 = vrsqrt.f32 %v225_v57 }
 0x12e   :  { %v849_v0 = vpop.eup %848 }
 0x12f   :  { %v229_v1 = vmul.f32 %v849_v0, %v202_v44  ;;  %v230_v2 = vmul.f32 %v849_v0, %v207_v43  ;;  %v228_v3 = vmul.f32 %v849_v0, %v197_v36  ;;  %v227_v4 = vmul.f32 %v849_v0, %v192_v37 }
 0x131   :  { %v249_v6 = vmul.f32 %v241_v58, %v229_v1  ;;  %v250_v7 = vmul.f32 %v245_v59, %v230_v2  ;;  %v248_v8 = vmul.f32 %v237_v61, %v228_v3  ;;  %v247_v9 = vmul.f32 %v233_v63, %v227_v4  ;;  %v324_v3 = vld [vmem:[%s1159_s2 + $0x8] sm:$0xff]  ;;  %v325_v4 = vld [vmem:[%s1159_s2 + $0x10] sm:$0xff] }
 0x133   :  { %v270_v11 = vadd.f32 %v265_v60, %v250_v7  ;;  %v269_v12 = vadd.f32 %v261_v62, %v249_v6  ;;  %v268_v13 = vadd.f32 %v257_v10, %v248_v8  ;;  %v267_v14 = vadd.f32 %v253_v5, %v247_v9  ;;  %v326_v5 = vld [vmem:[%s1159_s2 + $0x18] sm:$0xff]  ;;  %v522_v6 = vld [vmem:[%s1160_s4] sm:$0xff]  ;;  %v329_v7 = vpop.permute.xlu1 %328 }
 0x135   :  { %v274_v15 = vmin.f32 %v270_v11, 20.0  ;;  %v273_v16 = vmin.f32 %v269_v12, 20.0  ;;  %v272_v17 = vmin.f32 %v268_v13, 20.0  ;;  %v271_v18 = vmin.f32 %v267_v14, 20.0 }
 0x137   :  { %v281_v19 = vmul.f32 1.442695, %v274_v15  ;;  %v279_v20 = vmul.f32 1.442695, %v273_v16  ;;  %v277_v21 = vmul.f32 1.442695, %v272_v17  ;;  %v333_v8 = vpop.permute.xlu1 %332 }
 0x138   :  { %v275_v22 = vmul.f32 1.442695, %v271_v18 }
 0x139   :  { %850 = vpow2.f32 %v281_v19 }
 0x13a   :  { %852 = vpow2.f32 %v279_v20 }
 0x13b   :  { %854 = vpow2.f32 %v277_v21  ;;  %v341_v16 = vpop.permute.xlu1 %340 }
 0x13c   :  { %856 = vpow2.f32 %v275_v22 }
 0x146   :  { %v851_v23 = vpop.eup %850 }
 0x147   :  { %v853_v24 = vpop.eup %852  ;;  %v286_v25 = vadd.f32 1.0, %v851_v23 }
 0x148   :  { %v855_v26 = vpop.eup %854  ;;  %v285_v27 = vadd.f32 1.0, %v853_v24 }
 0x149   :  { %v857_v28 = vpop.eup %856  ;;  %v290_v29 = vmul.f32 %v286_v25, %v286_v25  ;;  %v284_v30 = vadd.f32 1.0, %v855_v26 }
 0x14a   :  { %v289_v31 = vmul.f32 %v285_v27, %v285_v27  ;;  %v283_v32 = vadd.f32 1.0, %v857_v28 }
 0x14b   :  { %v288_v33 = vmul.f32 %v284_v30, %v284_v30  ;;  %v294_v34 = vadd.f32 1.0, %v290_v29  ;;  %v718_v41 = vadd.f32 -1.0, %v290_v29 }
 0x14c   :  { %v293_v35 = vadd.f32 1.0, %v289_v31  ;;  %v287_v36 = vmul.f32 %v283_v32, %v283_v32  ;;  %v717_v46 = vadd.f32 -1.0, %v289_v31  ;;  %v463_v32 = vpop.permute.xlu1 %462 }
 0x14d   :  { %v292_v37 = vadd.f32 1.0, %v288_v33  ;;  %858 = vrcp.f32 %v294_v34  ;;  %v318_v51 = vmul.f32 %v718_v41, %v270_v11  ;;  %v716_v52 = vadd.f32 -1.0, %v288_v33 }
 0x14e   :  { %860 = vrcp.f32 %v293_v35  ;;  %v291_v38 = vadd.f32 1.0, %v287_v36  ;;  %v317_v57 = vmul.f32 %v717_v46, %v269_v12  ;;  %v715_v58 = vadd.f32 -1.0, %v287_v36 }
 0x14f   :  { %862 = vrcp.f32 %v292_v37  ;;  %v316_v61 = vmul.f32 %v716_v52, %v268_v13 }
 0x150   :  { %864 = vrcp.f32 %v291_v38  ;;  %v315_v0 = vmul.f32 %v715_v58, %v267_v14  ;;  %v337_v14 = vpop.permute.xlu0 %336 }
 0x154   :  { %v467_v36 = vpop.permute.xlu0 %466 }
 0x15a   :  { %v859_v39 = vpop.eup %858 }
 0x15b   :  { %v861_v40 = vpop.eup %860  ;;  %v302_v42 = vmul.f32 %v859_v39, %v294_v34 }
 0x15c   :  { %v863_v43 = vpop.eup %862  ;;  %v301_v44 = vmul.f32 %v861_v40, %v293_v35  ;;  %v471_v35 = vpop.permute.xlu1 %470 }
 0x15d   :  { %v865_v45 = vpop.eup %864  ;;  %v306_v47 = vsub.f32 2.0, %v302_v42  ;;  %v300_v48 = vmul.f32 %v863_v43, %v292_v37 }
 0x15e   :  { %v305_v49 = vsub.f32 2.0, %v301_v44  ;;  %v299_v50 = vmul.f32 %v865_v45, %v291_v38 }
 0x15f   :  { %v310_v53 = vmul.f32 %v859_v39, %v306_v47  ;;  %v304_v54 = vsub.f32 2.0, %v300_v48  ;;  %v483_v39 = vpop.permute.xlu0 %482 }
 0x160   :  { %v309_v55 = vmul.f32 %v861_v40, %v305_v49  ;;  %v303_v56 = vsub.f32 2.0, %v299_v50  ;;  %v475_v37 = vpop.permute.xlu1 %474 }
 0x161   :  { %v322_v59 = vmul.f32 %v318_v51, %v310_v53  ;;  %v308_v60 = vmul.f32 %v863_v43, %v304_v54 }
 0x162   :  { %v321_v62 = vmul.f32 %v317_v57, %v309_v55  ;;  %v307_v63 = vmul.f32 %v865_v45, %v303_v56 }
 0x163   :  { %801 = vmatprep.subr.mxu1 %v322_v59  ;;  %v320_v1 = vmul.f32 %v316_v61, %v308_v60  ;;  %v495_v50 = vpop.permute.xlu0 %494 }
 0x164   :  { %802 = vmatpush3.msra.mxu1 %v322_v59  ;;  %v319_v2 = vmul.f32 %v315_v0, %v307_v63  ;;  %v487_v38 = vpop.permute.xlu1 %486 }
 0x165   :  { %803 = vmatprep.subr.mxu1 %v321_v62 }
 0x166   :  { %804 = vmatpush3.msra.mxu1 %v321_v62 }
 0x167   :  { %805 = vmatprep.subr.mxu1 %v320_v1 }
 0x168   :  { %806 = vmatpush3.msra.mxu1 %v320_v1  ;;  %v491_v49 = vpop.permute.xlu1 %490 }
 0x169   :  { %807 = vmatprep.subr.mxu1 %v319_v2 }
 0x16a   :  { %808 = vmatpush3.msra.mxu1 %v319_v2 }
 0x16b   :  { %810 = vmatmul.mubr.msk.f32.vlgmr.msra.gmra.mxu1 %vm343_vm1, %v324_v3 }
 0x16c   :  { %812 = vmatprep.mubr.msk.f32.mxu1 %vm343_vm1, %v325_v4 }
 0x16f   :  { %813 = vmatmul.mubr.msk.f32.gmra.mxu1 %vm343_vm1, %v326_v5 }
 0x170   :  { %823 = vmatprep.mubr.msk.f32.mxu1 %vm343_vm1, %v522_v6 }
 0x22b   :  { %v811_v9 = vpop.f32.mrf.mxu1 }
 0x22c   :  { %v428_v11 = vadd.f32 %v811_v9, %v333_v8 }
 0x22d   :  { %v422_v10 = vpop.f32.mrf.mxu1 }
 0x22e   :  { %v423_v12 = vadd.f32 %v422_v10, %v329_v7  ;;  %v442_v18 = vmul.f32 %v428_v11, %v428_v11 }
 0x22f   :  { %v814_v13 = vpop.f32.mrf.mxu1 }
 0x230   :  { %v441_v15 = vmul.f32 %v423_v12, %v423_v12  ;;  %v438_v19 = vadd.f32 %v814_v13, %v341_v16  ;;  %v524_v13 = vld [vmem:[%s1160_s4 + $0x10] sm:$0xff] }
 0x231   :  { %v432_v17 = vpop.f32.mrf.mxu1 }
 0x232   :  { %v433_v20 = vadd.f32 %v432_v17, %v337_v14  ;;  %v445_v21 = vadd.f32 %v442_v18, %v441_v15  ;;  %v444_v23 = vmul.f32 %v438_v19, %v438_v19  ;;  %v525_v14 = vld [vmem:[%s1160_s4 + $0x18] sm:$0xff] }
 0x234   :  { %v443_v22 = vmul.f32 %v433_v20, %v433_v20 }
 0x236   :  { %v446_v24 = vadd.f32 %v445_v21, %v443_v22 }
 0x238   :  { %v447_v25 = vadd.f32 %v446_v24, %v444_v23 }
 0x23a   :  { %v448_v26 = vrot.slane %v447_v25, 4 }
 0x23c   :  { %v449_v27 = vadd.f32 %v448_v26, %v447_v25 }
 0x23e   :  { %v450_v28 = vrot.slane %v449_v27, 2 }
 0x240   :  { %v451_v29 = vadd.f32 %v450_v28, %v449_v27 }
 0x242   :  { %v452_v30 = vrot.slane %v451_v29, 1 }
 0x244   :  { %v453_v31 = vadd.f32 %v452_v30, %v451_v29 }
 0x246   :  { %v454_v33 = vmul.f32 0.03125, %v453_v31 }
 0x248   :  { %v455_v34 = vadd.f32 1e-05, %v454_v33 }
 0x24a   :  { %866 = vrsqrt.f32 %v455_v34 }
 0x257   :  { %v867_v40 = vpop.eup %866 }
 0x258   :  { %v457_v41 = vmul.f32 %v867_v40, %v423_v12  ;;  %v459_v42 = vmul.f32 %v867_v40, %v433_v20  ;;  %v460_v43 = vmul.f32 %v867_v40, %v438_v19  ;;  %v458_v44 = vmul.f32 %v867_v40, %v428_v11  ;;  %v523_v12 = vld [vmem:[%s1160_s4 + $0x8] sm:$0xff] }
 0x25a   :  { %v477_v45 = vmul.f32 %v463_v32, %v457_v41  ;;  %v479_v46 = vmul.f32 %v471_v35, %v459_v42  ;;  %v480_v47 = vmul.f32 %v475_v37, %v460_v43  ;;  %v478_v48 = vmul.f32 %v467_v36, %v458_v44 }
 0x25c   :  { %v498_v51 = vadd.f32 %v487_v38, %v478_v48  ;;  %v497_v52 = vadd.f32 %v483_v39, %v477_v45  ;;  %v499_v53 = vadd.f32 %v491_v49, %v479_v46  ;;  %v500_v54 = vadd.f32 %v495_v50, %v480_v47 }
 0x25e   :  { %v501_v55 = vmax.f32 %v497_v52, %v498_v51  ;;  %v502_v56 = vmax.f32 %v499_v53, %v500_v54 }
 0x260   :  { %v503_v57 = vmax.f32 %v501_v55, %v502_v56 }
 0x262   :  { %v504_v58 = vrot.slane %v503_v57, 4 }
 0x264   :  { %v505_v59 = vmax.f32 %v503_v57, %v504_v58 }
 0x266   :  { %v506_v60 = vrot.slane %v505_v59, 2 }
 0x268   :  { %v507_v61 = vmax.f32 %v505_v59, %v506_v60 }
 0x26a   :  { %v508_v62 = vrot.slane %v507_v61, 1 }
 0x26c   :  { %v509_v63 = vmax.f32 %v507_v61, %v508_v62 }
 0x26e   :  { %v513_v0 = vsub.f32 %v500_v54, %v509_v63  ;;  %v512_v1 = vsub.f32 %v499_v53, %v509_v63  ;;  %v511_v2 = vsub.f32 %v498_v51, %v509_v63  ;;  %v510_v4 = vsub.f32 %v497_v52, %v509_v63 }
 0x270   :  { %v520_v3 = vmul.f32 1.442695, %v513_v0  ;;  %v518_v5 = vmul.f32 1.442695, %v512_v1  ;;  %v516_v6 = vmul.f32 1.442695, %v511_v2 }
 0x271   :  { %v514_v7 = vmul.f32 1.442695, %v510_v4 }
 0x272   :  { %868 = vpow2.f32 %v520_v3 }
 0x273   :  { %870 = vpow2.f32 %v518_v5 }
 0x274   :  { %872 = vpow2.f32 %v516_v6 }
 0x275   :  { %874 = vpow2.f32 %v514_v7 }
 0x27f   :  { %v869_v8 = vpop.eup %868 }
 0x280   :  { %815 = vmatprep.subr.mxu1 %v869_v8  ;;  %v871_v9 = vpop.eup %870 }
 0x281   :  { %816 = vmatpush3.msra.mxu1 %v869_v8  ;;  %v873_v10 = vpop.eup %872 }
 0x282   :  { %817 = vmatprep.subr.mxu1 %v871_v9  ;;  %v875_v11 = vpop.eup %874 }
 0x283   :  { %818 = vmatpush3.msra.mxu1 %v871_v9 }
 0x284   :  { %819 = vmatprep.subr.mxu1 %v873_v10 }
 0x285   :  { %820 = vmatpush3.msra.mxu1 %v873_v10 }
 0x286   :  { %821 = vmatprep.subr.mxu1 %v875_v11 }
 0x287   :  { %822 = vmatpush3.msra.mxu1 %v875_v11 }
 0x288   :  { %824 = vmatmul.mubr.msk.f32.vlgmr.msra.gmra.mxu1 %vm343_vm1, %v523_v12 }
 0x289   :  { %826 = vmatprep.mubr.msk.f32.mxu1 %vm343_vm1, %v524_v13 }
 0x28c   :  { %827 = vmatmul.mubr.msk.f32.gmra.mxu1 %vm343_vm1, %v525_v14 }
 0x348   :  { %v825_v15 = vpop.f32.mrf.mxu1 }
 0x349   :  { %876 = vrcp.f32 %v825_v15 }
 0x34a   :  { %v604_v16 = vpop.f32.mrf.mxu1 }
 0x34b   :  { %878 = vrcp.f32 %v604_v16 }
 0x34c   :  { %v828_v17 = vpop.f32.mrf.mxu1 }
 0x34d   :  { %880 = vrcp.f32 %v828_v17 }
 0x34e   :  { %v614_v18 = vpop.f32.mrf.mxu1 }
 0x34f   :  { %882 = vrcp.f32 %v614_v18 }
 0x356   :  { %v877_v19 = vpop.eup %876 }
 0x357   :  { %v628_v20 = vmul.f32 %v877_v19, %v825_v15 }
 0x358   :  { %v879_v21 = vpop.eup %878 }
 0x359   :  { %v627_v22 = vmul.f32 %v879_v21, %v604_v16  ;;  %v632_v24 = vsub.f32 2.0, %v628_v20 }
 0x35a   :  { %v881_v23 = vpop.eup %880 }
 0x35b   :  { %v631_v25 = vsub.f32 2.0, %v627_v22  ;;  %v636_v29 = vmul.f32 %v877_v19, %v632_v24  ;;  %v630_v30 = vmul.f32 %v881_v23, %v828_v17 }
 0x35c   :  { %v883_v26 = vpop.eup %882 }
 0x35d   :  { %v635_v27 = vmul.f32 %v879_v21, %v631_v25  ;;  %v629_v28 = vmul.f32 %v883_v26, %v614_v18  ;;  %v640_v33 = vmul.f32 %v873_v10, %v636_v29  ;;  %v634_v34 = vsub.f32 2.0, %v630_v30 }
 0x35f   :  { %v633_v31 = vsub.f32 2.0, %v629_v28  ;;  %v639_v32 = vmul.f32 %v875_v11, %v635_v27  ;;  %v638_v36 = vmul.f32 %v881_v23, %v634_v34 }
 0x361   :  { %643 = vxpose.xlu1.b32.start [1/4] (short) %v639_v32, 128  ;;  %v637_v35 = vmul.f32 %v883_v26, %v633_v31  ;;  %v642_v38 = vmul.f32 %v869_v8, %v638_v36 }
 0x363   :  { %v641_v37 = vmul.f32 %v871_v9, %v637_v35 }
 0x365   :  { %644 = vxpose.xlu1.b32.cont [2/4] (short) %v640_v33, 128 }
 0x369   :  { %645 = vxpose.xlu1.b32.cont [3/4] (short) %v641_v37, 128 }
 0x36d   :  { %646 = vxpose.xlu1.b32.end [4/4] (short) %v642_v38, 128 }
 0x3dd   :  { %v659_v39 = vpop.trf.xlu1 }
 0x3de   :  { %675 = vst.msk [vmem:[%s1161_s5] sm:$0xff] %vm343_vm1, %v659_v39 }
 0x3e1   :  { %v660_v40 = vpop.trf.xlu1 }
 0x3e2   :  { %676 = vst.msk [vmem:[%s1161_s5 + $0x8] sm:$0xff] %vm343_vm1, %v660_v40 }
 0x3e5   :  { %v661_v41 = vpop.trf.xlu1 }
 0x3e6   :  { %677 = vst.msk [vmem:[%s1161_s5 + $0x10] sm:$0xff] %vm343_vm1, %v661_v41 }
 0x3e9   :  { %v662_v42 = vpop.trf.xlu1 }
 0x3ea   :  { %678 = vst.msk [vmem:[%s1161_s5 + $0x18] sm:$0xff] %vm343_vm1, %v662_v42 }
 0x3ed   :  { %v663_v43 = vpop.trf.xlu1 }
 0x3ee   :  { %679 = vst.msk [vmem:[%s1161_s5 + $0x20] sm:$0xff] %vm343_vm1, %v663_v43 }
 0x3f1   :  { %v664_v44 = vpop.trf.xlu1 }
 0x3f2   :  { %680 = vst.msk [vmem:[%s1161_s5 + $0x28] sm:$0xff] %vm343_vm1, %v664_v44 }
 0x3f5   :  { %v665_v45 = vpop.trf.xlu1 }
 0x3f6   :  { %681 = vst.msk [vmem:[%s1161_s5 + $0x30] sm:$0xff] %vm343_vm1, %v665_v45 }
 0x3f9   :  { %v666_v46 = vpop.trf.xlu1 }
 0x3fa   :  { %682 = vst.msk [vmem:[%s1161_s5 + $0x38] sm:$0xff] %vm343_vm1, %v666_v46 }
 0x3fd   :  { %v667_v47 = vpop.trf.xlu1 }
 0x3fe   :  { %683 = vst.msk [vmem:[%s1161_s5 + $0x40] sm:$0xff] %vm343_vm1, %v667_v47 }
 0x401   :  { %v668_v48 = vpop.trf.xlu1 }
 0x402   :  { %684 = vst.msk [vmem:[%s1161_s5 + $0x48] sm:$0xff] %vm343_vm1, %v668_v48 }
 0x405   :  { %v669_v49 = vpop.trf.xlu1 }
 0x406   :  { %685 = vst.msk [vmem:[%s1161_s5 + $0x50] sm:$0xff] %vm343_vm1, %v669_v49 }
 0x409   :  { %v670_v50 = vpop.trf.xlu1 }
 0x40a   :  { %686 = vst.msk [vmem:[%s1161_s5 + $0x58] sm:$0xff] %vm343_vm1, %v670_v50 }
 0x40d   :  { %v671_v51 = vpop.trf.xlu1 }
 0x40e   :  { %687 = vst.msk [vmem:[%s1161_s5 + $0x60] sm:$0xff] %vm343_vm1, %v671_v51 }
 0x411   :  { %v672_v52 = vpop.trf.xlu1 }
 0x412   :  { %688 = vst.msk [vmem:[%s1161_s5 + $0x68] sm:$0xff] %vm343_vm1, %v672_v52 }
 0x415   :  { %v673_v53 = vpop.trf.xlu1 }
 0x416   :  { %689 = vst.msk [vmem:[%s1161_s5 + $0x70] sm:$0xff] %vm343_vm1, %v673_v53 }
 0x419   :  { %v674_v54 = vpop.trf.xlu1 }
 0x41a   :  { %690 = vst.msk [vmem:[%s1161_s5 + $0x78] sm:$0xff] %vm343_vm1, %v674_v54 }

</bundles_post_ra>
